<compile_context>
chip_gen: v6e
topology: v6e:2x2x1
jax: 0.10.0
libtpu: 0.0.40
codegen_flags: <defaults>
</compile_context>

<pallas_src>
import jax
import jax.numpy as jnp
from jax import lax
from jax.experimental import pallas as pl
from jax.experimental.pallas import tpu as pltpu

_LANE = 128
_SUBLANE = 8


def _round_up(n, m):
    return ((n + m - 1) // m) * m


def _two_layer_nn_kernel(x_ref, w1_ref, b1_ref, w2_ref, b2_ref, o_ref):
    # x_ref:  (TB, D)  batch tile streamed from HBM
    # w1_ref: (H, D)   layer-1 weight (torch layout), VMEM-resident
    # b1_ref: (H, 1)   layer-1 bias as a column (broadcast over lanes)
    # w2_ref: (H, 1)   layer-2 weight as a column
    # b2_ref: (1,)     layer-2 bias scalar, in SMEM
    # o_ref:  (1, TB)  lane-dense output tile (batch on the lane axis)

    # Layer 1 (MXU): hT = relu(w1 @ x_tile.T + b1)  -> (H, TB), lane-dense output.
    h_t = lax.dot_general(
        w1_ref[...], x_ref[...],
        dimension_numbers=(((1,), (1,)), ((), ())),   # contract D with D
        preferred_element_type=jnp.float32,
    )
    h_t = jnp.maximum(h_t + b1_ref[...], 0.0)

    # Layer 2 (VPU mul + sublane reduce): z = w2 . h + b2  -> (1, TB).
    z = jnp.sum(h_t * w2_ref[...], axis=0, keepdims=True) + b2_ref[0]

    # Sigmoid epilogue: exp -> EUP; exact divide keeps 1e-5 validation tight.
    # (pl.reciprocal(..., approx=True) is available if the tolerance is relaxed.)
    o_ref[...] = (1.0 / (1.0 + jnp.exp(-z))).astype(o_ref.dtype)


def _choose_batch_tile(B, D):
    """Pick (tile_rows, grid_steps) for the batch axis.

    * B <= 256: a single full-array block (block dims == array dims), zero padding.
    * otherwise: 128-aligned tile rows sized so each step moves >= ~2 MiB of x while
      two x pipeline buffers stay within ~24 MiB of VMEM, with an even number of
      grid steps (>= 2) so both v7x TensorCores get work.  The ragged last block is
      handled by Pallas edge masking -- no jnp.pad of x.
    """
    if B <= 256:
        return B, 1
    row_bytes = 4 * D
    target_rows = max((2 << 20) // row_bytes, 512)            # >= ~2 MiB of x / step
    budget_rows = max((24 << 20) // (2 * row_bytes), _LANE)   # 2 x-buffers <= 24 MiB
    tb_cap = _round_up(min(target_rows, budget_rows), _LANE)
    steps = pl.cdiv(B, tb_cap)
    if steps % 2:
        steps += 1                                            # even split across 2 TCs (v7x)
    tb = _round_up(pl.cdiv(B, steps), _LANE)
    return tb, pl.cdiv(B, tb)


def _vmem_limit_bytes(tb, D, H, resident_buffers):
    f32 = 4
    x_buf = 2 * _round_up(tb, _SUBLANE) * _round_up(D, _LANE) * f32          # double-buffered
    w1_buf = resident_buffers * _round_up(H, _SUBLANE) * _round_up(D, _LANE) * f32
    vec_buf = 2 * resident_buffers * _round_up(H, _SUBLANE) * _LANE * f32    # b1, w2 columns
    out_buf = 2 * _SUBLANE * _round_up(tb, _LANE) * f32
    need = x_buf + w1_buf + vec_buf + out_buf
    # ~40% headroom for compiler temporaries; floor at the v6e/v7x default (32 MiB),
    # cap 25% below v7x's 64 MiB physical VMEM.
    return int(min(max(need * 1.4 + (2 << 20), 32 << 20), 48 << 20))


def _build_two_layer_call(B, D, H, tb, steps, resident_buffers):
    resident = (
        dict(pipeline_mode=pl.Buffered(1)) if resident_buffers == 1 else {}
    )
    return pl.pallas_call(
        _two_layer_nn_kernel,
        out_shape=jax.ShapeDtypeStruct((1, B), jnp.float32),
        grid=(steps,),
        in_specs=[
            pl.BlockSpec((tb, D), lambda i: (i, 0)),                 # x: streamed over batch
            pl.BlockSpec((H, D), lambda i: (0, 0), **resident),      # w1: VMEM-resident
            pl.BlockSpec((H, 1), lambda i: (0, 0), **resident),      # b1: VMEM-resident
            pl.BlockSpec((H, 1), lambda i: (0, 0), **resident),      # w2: VMEM-resident
            pl.BlockSpec(memory_space=pltpu.MemorySpace.SMEM),       # b2 scalar
        ],
        out_specs=pl.BlockSpec((1, tb), lambda i: (0, i)),           # lane-dense output
        compiler_params=pltpu.CompilerParams(
            dimension_semantics=("parallel",),                       # shard batch across TCs
            vmem_limit_bytes=_vmem_limit_bytes(tb, D, H, resident_buffers),
        ),
    )


def two_layer_nn(x, w1, b1, w2, b2):
    """x: (B, D) f32; w1: (H, D); b1: (H,); w2: (1, H); b2: (1,)  (torch layouts)."""
    B, D = x.shape
    H = w1.shape[0]
    tb, steps = _choose_batch_tile(B, D)

    b1_col = b1.reshape(H, 1)
    w2_col = w2.reshape(H, 1)   # (1, H) -> (H, 1): trivial reshape, no transpose pass

    # TODO(synk): if H*D*4 bytes of weights stops fitting comfortably in VMEM
    # (> ~40 MiB, half that on v7x) add a tiled-weight path: grid over D as an
    # "arbitrary" reduction axis with an f32 VMEM accumulator instead of the
    # fully resident w1.

    args = (x, w1, b1_col, w2_col, b2)
    try:
        # Single-buffer the grid-invariant operands (w1/b1/w2) to halve their VMEM.
        out_t = _build_two_layer_call(B, D, H, tb, steps, resident_buffers=1)(*args)
        out_t = jax.block_until_ready(out_t)
    except Exception:
        # Fallback for jax/libtpu builds that reject pl.Buffered(1): default 2 buffers.
        out_t = _build_two_layer_call(B, D, H, tb, steps, resident_buffers=2)(*args)

    # Back to the torch output layout (B, 1).
    return out_t[0].reshape(B, 1)


def reference(x, w1, b1, w2, b2):
    h = jnp.maximum(x @ w1.T + b1, 0.0)
    return 1.0 / (1.0 + jnp.exp(-(h @ w2.T + b2)))


if __name__ == "__main__":
    key = jax.random.PRNGKey(0)
    kx1, kx2, kw1, kb1, kw2, kb2 = jax.random.split(key, 6)

    input_dim, hidden_dim = 16, 32

    # Deterministic init mimicking nn.Linear: U(-1/sqrt(fan_in), 1/sqrt(fan_in)).
    bound1 = 1.0 / jnp.sqrt(jnp.float32(input_dim))
    w1 = jax.random.uniform(kw1, (hidden_dim, input_dim), jnp.float32, -bound1, bound1)
    b1 = jax.random.uniform(kb1, (hidden_dim,), jnp.float32, -bound1, bound1)
    bound2 = 1.0 / jnp.sqrt(jnp.float32(hidden_dim))
    w2 = jax.random.uniform(kw2, (1, hidden_dim), jnp.float32, -bound2, bound2)
    b2 = jax.random.uniform(kb2, (1,), jnp.float32, -bound2, bound2)

    # Case 1: small ragged batch -> single full-array block, zero padding.
    x_small = jax.random.normal(kx1, (13, input_dim), dtype=jnp.float32)
    out_small = jax.block_until_ready(two_layer_nn(x_small, w1, b1, w2, b2))
    ref_small = reference(x_small, w1, b1, w2, b2)
    assert out_small.shape == (13, 1)
    assert jnp.allclose(out_small, ref_small, atol=1e-5, rtol=1e-5), float(
        jnp.max(jnp.abs(out_small - ref_small)))

    # Case 2: B=300 -> two 128-aligned batch tiles with a ragged (masked) edge block,
    # exercising the pad-free multi-step pipeline path.
    x_big = jax.random.normal(kx2, (300, input_dim), dtype=jnp.float32)
    out_big = jax.block_until_ready(two_layer_nn(x_big, w1, b1, w2, b2))
    ref_big = reference(x_big, w1, b1, w2, b2)
    assert out_big.shape == (300, 1)
    assert jnp.allclose(out_big, ref_big, atol=1e-5, rtol=1e-5), float(
        jnp.max(jnp.abs(out_big - ref_big)))

    print("KERNEL_OK")
</pallas_src>

<mosaic_0001>
module attributes {stable_mosaic.version = 11 : i64} {
  func.func @_two_layer_nn_kernel(%arg0: i32, %arg1: memref<13x16xf32, #tpu.memory_space<vmem>>, %arg2: memref<32x16xf32, #tpu.memory_space<vmem>>, %arg3: memref<32x1xf32, #tpu.memory_space<vmem>>, %arg4: memref<32x1xf32, #tpu.memory_space<vmem>>, %arg5: memref<1xf32, #tpu.memory_space<smem>>, %arg6: memref<1x13xf32, #tpu.memory_space<vmem>>) attributes {dimension_semantics = [#tpu.dimension_semantics<parallel>], iteration_bounds = array<i64: 1>, scalar_prefetch = 0 : i64, scratch_operands = 0 : i64, tpu.core_type = #tpu.core_type<tc>, window_params = [{transform_indices = @transform_0, window_bounds = array<i64: 13, 16>}, {pipeline_mode = #tpu.pipeline_mode<synchronous>, transform_indices = @transform_1, window_bounds = array<i64: 32, 16>}, {pipeline_mode = #tpu.pipeline_mode<synchronous>, transform_indices = @transform_2, window_bounds = array<i64: 32, 1>}, {pipeline_mode = #tpu.pipeline_mode<synchronous>, transform_indices = @transform_3, window_bounds = array<i64: 32, 1>}, {transform_indices = @transform_4, window_bounds = array<i64: 1>}, {transform_indices = @transform_5, window_bounds = array<i64: 1, 13>}]} {
    %c0 = arith.constant 0 : index
    %c0_0 = arith.constant 0 : index
    %0 = vector.load %arg2[%c0, %c0_0] : memref<32x16xf32, #tpu.memory_space<vmem>>, vector<32x16xf32>
    %c0_1 = arith.constant 0 : index
    %c0_2 = arith.constant 0 : index
    %1 = vector.load %arg1[%c0_1, %c0_2] : memref<13x16xf32, #tpu.memory_space<vmem>>, vector<13x16xf32>
    %cst = arith.constant dense<0.000000e+00> : vector<32x13xf32>
    %2 = tpu.matmul %0, %1, %cst {dimension_numbers = #tpu.dot_dimension_numbers<[1], [1], [0], [0], [0, 0, 1, 0], [], []>} : vector<32x16xf32>, vector<13x16xf32>, vector<32x13xf32> -> vector<32x13xf32>
    %c0_3 = arith.constant 0 : index
    %c0_4 = arith.constant 0 : index
    %3 = vector.load %arg3[%c0_3, %c0_4] : memref<32x1xf32, #tpu.memory_space<vmem>>, vector<32x1xf32>
    %4 = vector.broadcast %3 : vector<32x1xf32> to vector<32x13xf32>
    %5 = arith.addf %2, %4 : vector<32x13xf32>
    %cst_5 = arith.constant 0.000000e+00 : f32
    %6 = vector.broadcast %cst_5 : f32 to vector<32x13xf32>
    %7 = arith.maximumf %5, %6 : vector<32x13xf32>
    %c0_6 = arith.constant 0 : index
    %c0_7 = arith.constant 0 : index
    %8 = vector.load %arg4[%c0_6, %c0_7] : memref<32x1xf32, #tpu.memory_space<vmem>>, vector<32x1xf32>
    %9 = vector.broadcast %8 : vector<32x1xf32> to vector<32x13xf32>
    %10 = arith.mulf %7, %9 : vector<32x13xf32>
    %cst_8 = arith.constant dense<0.000000e+00> : vector<13xf32>
    %11 = vector.multi_reduction <add>, %10, %cst_8 [0] : vector<32x13xf32> to vector<13xf32>
    %12 = vector.shape_cast %11 : vector<13xf32> to vector<1x13xf32>
    %c0_9 = arith.constant 0 : index
    %13 = memref.load %arg5[%c0_9] : memref<1xf32, #tpu.memory_space<smem>>
    %14 = vector.broadcast %13 : f32 to vector<1x13xf32>
    %15 = arith.addf %12, %14 : vector<1x13xf32>
    %cst_10 = arith.constant 0.000000e+00 : f32
    %16 = vector.broadcast %cst_10 : f32 to vector<1x13xf32>
    %17 = arith.subf %16, %15 : vector<1x13xf32>
    %18 = math.exp %17 : vector<1x13xf32>
    %cst_11 = arith.constant 1.000000e+00 : f32
    %19 = vector.broadcast %cst_11 : f32 to vector<1x13xf32>
    %20 = arith.addf %19, %18 : vector<1x13xf32>
    %cst_12 = arith.constant 1.000000e+00 : f32
    %21 = vector.broadcast %cst_12 : f32 to vector<1x13xf32>
    %22 = arith.divf %21, %20 : vector<1x13xf32>
    %c0_13 = arith.constant 0 : index
    %c0_14 = arith.constant 0 : index
    %23 = vector.load %arg6[%c0_13, %c0_14] : memref<1x13xf32, #tpu.memory_space<vmem>>, vector<1x13xf32>
    tpu.vector_store %arg6[%c0_13, %c0_14], %22 {strides = array<i32>} : memref<1x13xf32, #tpu.memory_space<vmem>>, vector<1x13xf32>,
    return
  }
  func.func @transform_0(%arg0: i32) -> (i32, i32) {
    %c0_i32 = arith.constant 0 : i32
    %c0_i32_0 = arith.constant 0 : i32
    return %arg0, %c0_i32 : i32, i32
  }
  func.func @transform_1(%arg0: i32) -> (i32, i32) {
    %c0_i32 = arith.constant 0 : i32
    %c0_i32_0 = arith.constant 0 : i32
    %c0_i32_1 = arith.constant 0 : i32
    return %c0_i32, %c0_i32_0 : i32, i32
  }
  func.func @transform_2(%arg0: i32) -> (i32, i32) {
    %c0_i32 = arith.constant 0 : i32
    %c0_i32_0 = arith.constant 0 : i32
    %c0_i32_1 = arith.constant 0 : i32
    return %c0_i32, %c0_i32_0 : i32, i32
  }
  func.func @transform_3(%arg0: i32) -> (i32, i32) {
    %c0_i32 = arith.constant 0 : i32
    %c0_i32_0 = arith.constant 0 : i32
    %c0_i32_1 = arith.constant 0 : i32
    return %c0_i32, %c0_i32_0 : i32, i32
  }
  func.func @transform_4(%arg0: i32) -> i32 {
    %c0_i32 = arith.constant 0 : i32
    %c0_i32_0 = arith.constant 0 : i32
    return %c0_i32 : i32
  }
  func.func @transform_5(%arg0: i32) -> (i32, i32) {
    %c0_i32 = arith.constant 0 : i32
    %c0_i32_0 = arith.constant 0 : i32
    return %c0_i32, %arg0 : i32, i32
  }
}

module attributes {stable_mosaic.version = 11 : i64} {
  func.func @_two_layer_nn_kernel(%arg0: i32, %arg1: memref<13x16xf32, #tpu.memory_space<vmem>>, %arg2: memref<32x16xf32, #tpu.memory_space<vmem>>, %arg3: memref<32x1xf32, #tpu.memory_space<vmem>>, %arg4: memref<32x1xf32, #tpu.memory_space<vmem>>, %arg5: memref<1xf32, #tpu.memory_space<smem>>, %arg6: memref<1x13xf32, #tpu.memory_space<vmem>>) attributes {dimension_semantics = [#tpu.dimension_semantics<parallel>], iteration_bounds = array<i64: 1>, scalar_prefetch = 0 : i64, scratch_operands = 0 : i64, tpu.core_type = #tpu.core_type<tc>, window_params = [{transform_indices = @transform_0, window_bounds = array<i64: 13, 16>}, {pipeline_mode = #tpu.pipeline_mode<synchronous>, transform_indices = @transform_1, window_bounds = array<i64: 32, 16>}, {pipeline_mode = #tpu.pipeline_mode<synchronous>, transform_indices = @transform_2, window_bounds = array<i64: 32, 1>}, {pipeline_mode = #tpu.pipeline_mode<synchronous>, transform_indices = @transform_3, window_bounds = array<i64: 32, 1>}, {transform_indices = @transform_4, window_bounds = array<i64: 1>}, {transform_indices = @transform_5, window_bounds = array<i64: 1, 13>}]} {
    %c0 = arith.constant 0 : index
    %c0_0 = arith.constant 0 : index
    %0 = vector.load %arg2[%c0, %c0_0] : memref<32x16xf32, #tpu.memory_space<vmem>>, vector<32x16xf32>
    %c0_1 = arith.constant 0 : index
    %c0_2 = arith.constant 0 : index
    %1 = vector.load %arg1[%c0_1, %c0_2] : memref<13x16xf32, #tpu.memory_space<vmem>>, vector<13x16xf32>
    %cst = arith.constant dense<0.000000e+00> : vector<32x13xf32>
    %2 = tpu.matmul %0, %1, %cst {dimension_numbers = #tpu.dot_dimension_numbers<[1], [1], [0], [0], [0, 0, 1, 0], [], []>} : vector<32x16xf32>, vector<13x16xf32>, vector<32x13xf32> -> vector<32x13xf32>
    %c0_3 = arith.constant 0 : index
    %c0_4 = arith.constant 0 : index
    %3 = vector.load %arg3[%c0_3, %c0_4] : memref<32x1xf32, #tpu.memory_space<vmem>>, vector<32x1xf32>
    %4 = vector.broadcast %3 : vector<32x1xf32> to vector<32x13xf32>
    %5 = arith.addf %2, %4 : vector<32x13xf32>
    %cst_5 = arith.constant 0.000000e+00 : f32
    %6 = vector.broadcast %cst_5 : f32 to vector<32x13xf32>
    %7 = arith.maximumf %5, %6 : vector<32x13xf32>
    %c0_6 = arith.constant 0 : index
    %c0_7 = arith.constant 0 : index
    %8 = vector.load %arg4[%c0_6, %c0_7] : memref<32x1xf32, #tpu.memory_space<vmem>>, vector<32x1xf32>
    %9 = vector.broadcast %8 : vector<32x1xf32> to vector<32x13xf32>
    %10 = arith.mulf %7, %9 : vector<32x13xf32>
    %cst_8 = arith.constant dense<0.000000e+00> : vector<13xf32>
    %11 = vector.multi_reduction <add>, %10, %cst_8 [0] : vector<32x13xf32> to vector<13xf32>
    %12 = vector.shape_cast %11 : vector<13xf32> to vector<1x13xf32>
    %c0_9 = arith.constant 0 : index
    %13 = memref.load %arg5[%c0_9] : memref<1xf32, #tpu.memory_space<smem>>
    %14 = vector.broadcast %13 : f32 to vector<1x13xf32>
    %15 = arith.addf %12, %14 : vector<1x13xf32>
    %cst_10 = arith.constant 0.000000e+00 : f32
    %16 = vector.broadcast %cst_10 : f32 to vector<1x13xf32>
    %17 = arith.subf %16, %15 : vector<1x13xf32>
    %18 = math.exp %17 : vector<1x13xf32>
    %cst_11 = arith.constant 1.000000e+00 : f32
    %19 = vector.broadcast %cst_11 : f32 to vector<1x13xf32>
    %20 = arith.addf %19, %18 : vector<1x13xf32>
    %cst_12 = arith.constant 1.000000e+00 : f32
    %21 = vector.broadcast %cst_12 : f32 to vector<1x13xf32>
    %22 = arith.divf %21, %20 : vector<1x13xf32>
    %c0_13 = arith.constant 0 : index
    %c0_14 = arith.constant 0 : index
    %23 = vector.load %arg6[%c0_13, %c0_14] : memref<1x13xf32, #tpu.memory_space<vmem>>, vector<1x13xf32>
    tpu.vector_store %arg6[%c0_13, %c0_14], %22 {strides = array<i32>} : memref<1x13xf32, #tpu.memory_space<vmem>>, vector<1x13xf32>,
    return
  }
  func.func @transform_0(%arg0: i32) -> (i32, i32) {
    %c0_i32 = arith.constant 0 : i32
    %c0_i32_0 = arith.constant 0 : i32
    return %arg0, %c0_i32 : i32, i32
  }
  func.func @transform_1(%arg0: i32) -> (i32, i32) {
    %c0_i32 = arith.constant 0 : i32
    %c0_i32_0 = arith.constant 0 : i32
    %c0_i32_1 = arith.constant 0 : i32
    return %c0_i32, %c0_i32_0 : i32, i32
  }
  func.func @transform_2(%arg0: i32) -> (i32, i32) {
    %c0_i32 = arith.constant 0 : i32
    %c0_i32_0 = arith.constant 0 : i32
    %c0_i32_1 = arith.constant 0 : i32
    return %c0_i32, %c0_i32_0 : i32, i32
  }
  func.func @transform_3(%arg0: i32) -> (i32, i32) {
    %c0_i32 = arith.constant 0 : i32
    %c0_i32_0 = arith.constant 0 : i32
    %c0_i32_1 = arith.constant 0 : i32
    return %c0_i32, %c0_i32_0 : i32, i32
  }
  func.func @transform_4(%arg0: i32) -> i32 {
    %c0_i32 = arith.constant 0 : i32
    %c0_i32_0 = arith.constant 0 : i32
    return %c0_i32 : i32
  }
  func.func @transform_5(%arg0: i32) -> (i32, i32) {
    %c0_i32 = arith.constant 0 : i32
    %c0_i32_0 = arith.constant 0 : i32
    return %c0_i32, %arg0 : i32, i32
  }
}

</mosaic_0001>

<bundles_post_ra>
// kernel: tpu_custom_call.1
= control target key start
LH: loop header
LB: loop body
LE: loop exit
PB: predicated region body
PF: predicated region fallthrough
CT: control target
= control target key end

     0   :  { %vm52_vm0 = vcmask 130048   ;;  %s375_s0 = inlined_call_operand.vmem [shape: f32[13,16], index: 0, kind: input, shape index: {}]   ;;  %s376_s1 = inlined_call_operand.vmem [shape: f32[32,16], index: 1, kind: input, shape index: {}]   ;;  %s377_s2 = inlined_call_operand.vmem [shape: f32[32,1], index: 2, kind: input, shape index: {}]   ;;  %s378_s3 = inlined_call_operand.vmem [shape: f32[32,1], index: 3, kind: input, shape index: {}]   ;;  %s379_s4 = inlined_call_operand.<no memory space> [shape: f32[1], index: 4, kind: input, shape index: {}]   ;;  %s380_s5 = inlined_call_operand.hbm [shape: f32[1,13], index: 5, kind: output, shape index: {}]  }
   0x1   :  { %v27_v0 = vld [vmem:[%s375_s0 + $0x8] sm:$0x1f]  ;;  %v26_v1 = vld [vmem:[%s375_s0] sm:$0xff]  ;;  %v24_v3 = vld [vmem:[%s376_s1 + $0x10] sm:$0xff] }
   0x2   :  { %239 = vmatprep.subr.msk.mxu0 %vm52_vm0, %v27_v0  ;;  %249 = vmatprep.subr.msk.mxu1 %vm52_vm0, %v27_v0  ;;  %v22_v2 = vld [vmem:[%s376_s1] sm:$0xff]  ;;  %v30_v5 = vld [vmem:[%s377_s2 + $0x10] sm:$0xff] }
   0x3   :  { %240 = vmatpush3.xpose.msk.msra.mxu0 %vm52_vm0, %v27_v0  ;;  %251 = vmatpush3.xpose.msk.msra.mxu1 %vm52_vm0, %v27_v0  ;;  %v28_v4 = vld [vmem:[%s377_s2] sm:$0xff] }
   0x4   :  { %241 = vmatprep.subr.msk.mxu0 %vm52_vm0, %v26_v1  ;;  %250 = vmatprep.subr.msk.mxu1 %vm52_vm0, %v26_v1 }
   0x5   :  { %243 = vmatprep.mubr.msk.f32.mxu0 %vm52_vm0, %v22_v2  ;;  %246 = vmatprep.mubr.msk.f32.mxu1 %vm52_vm0, %v24_v3 }
   0x6   :  { %11 = vsyncpa [#allocation4], 0  ;;  %v283_v6 = vmov 0   ;;  %v23_v7 = vld [vmem:[%s376_s1 + $0x8] sm:$0xff]  ;;  %v25_v8 = vld [vmem:[%s376_s1 + $0x18] sm:$0xff]  ;;  %vm188_vm1 = vcmask 105472   ;;  %v203_v51 = vstv %s379_s4 }
   0x7   :  { %255 = vset.pattern.permute.xlu0 %v283_v6  ;;  %256 = vset.pattern.permute.xlu1 %v283_v6  ;;  %v29_v9 = vld [vmem:[%s377_s2 + $0x8] sm:$0xff]  ;;  %v31_v10 = vld [vmem:[%s377_s2 + $0x18] sm:$0xff]  ;;  %v160_v11 = vld [vmem:[%s378_s3] sm:$0xff]  ;;  %s284_s19 = smov [#allocation3]   ;;  %vm211_vm2 = vcmask 98304  }
   0x8   :  { %242 = vmatpush3.xpose.msk.msra.mxu0 %vm52_vm0, %v26_v1  ;;  %252 = vmatpush3.xpose.msk.msra.mxu1 %vm52_vm0, %v26_v1  ;;  %v161_v12 = vld [vmem:[%s378_s3 + $0x8] sm:$0xff]  ;;  %v162_v13 = vld [vmem:[%s378_s3 + $0x10] sm:$0xff]  ;;  %v163_v14 = vld [vmem:[%s378_s3 + $0x18] sm:$0xff]  ;;  %s219_s20 = sshll.u32 %s284_s19, 4  ;;  %s220_s20 = int_to_ptr.vmem [resolvable:$true] %s219_s20 }
   0x9   :  { %34 = vperm.xlu0 %255, %v28_v4   ;;  %44 = vperm.xlu1 %256, %v30_v5   ;;  %s261_s21 = scalar_lea.vmem %s220_s20, 16  ;;  %s265_s22 = scalar_lea.vmem %s220_s20, 32 }
   0xa   :  { %p262_p0 = scmp.ne.s32.totalorder %s220_s20, %s261_s21  ;;  %p266_p1 = scmp.lt.s32.totalorder %s220_s20, %s220_s20 }
   0xb   :  { %244 = vmatmul.mubr.msk.f32.vlgmr.msra.gmra.mxu0 %vm52_vm0, %v23_v7  ;;  %247 = vmatmul.mubr.msk.f32.vlgmr.msra.gmra.mxu1 %vm52_vm0, %v25_v8  ;;  %p267_p2 = scmp.lt.s32.totalorder %s265_s22, %s261_s21 }
   0xd   :  { %39 = vperm.xlu0 %255, %v29_v9   ;;  %49 = vperm.xlu1 %256, %v31_v10   ;;  %p268_p3 = por %p267_p2, %p266_p1 }
   0xf   :  { %p269_p4 = pnand %p268_p3, %p262_p0 }
  0x11   :  { %166 = vperm.xlu0 %255, %v160_v11   ;;  %171 = vperm.xlu1 %256, %v161_v12  }
  0x15   :  { %176 = vperm.xlu0 %255, %v162_v13   ;;  %181 = vperm.xlu1 %256, %v163_v14  }
  0x84   :  { %v35_v15 = vpop.permute.xlu0 %34  ;;  %v45_v16 = vpop.permute.xlu1 %44 }
  0x88   :  { %v40_v17 = vpop.permute.xlu0 %39  ;;  %v50_v18 = vpop.permute.xlu1 %49 }
  0x8c   :  { %v167_v19 = vpop.permute.xlu0 %166  ;;  %v172_v22 = vpop.permute.xlu1 %171 }
  0x90   :  { %v177_v34 = vpop.permute.xlu0 %176  ;;  %v182_v37 = vpop.permute.xlu1 %181 }
  0xcb   :  { %v245_v20 = vpop.f32.mrf.mxu0  ;;  %v248_v21 = vpop.f32.mrf.mxu1 }
  0xcc   :  { %v143_v23 = vadd.f32 %v245_v20, %v40_v17  ;;  %v153_v24 = vadd.f32 %v248_v21, %v50_v18 }
  0xcd   :  { %v137_v25 = vpop.f32.mrf.mxu0  ;;  %v147_v26 = vpop.f32.mrf.mxu1 }
  0xce   :  { %v157_v27 = vmax.f32 %v143_v23, 0.0  ;;  %v138_v28 = vadd.f32 %v137_v25, %v35_v15  ;;  %v148_v29 = vadd.f32 %v147_v26, %v45_v16  ;;  %v159_v31 = vmax.f32 %v153_v24, 0.0 }
  0xd0   :  { %v185_v30 = vmul.f32 %v172_v22, %v157_v27  ;;  %v156_v32 = vmax.f32 %v138_v28, 0.0  ;;  %v158_v33 = vmax.f32 %v148_v29, 0.0  ;;  %v187_v39 = vmul.f32 %v182_v37, %v159_v31 }
  0xd2   :  { %v184_v35 = vmul.f32 %v167_v19, %v156_v32  ;;  %v186_v36 = vmul.f32 %v177_v34, %v158_v33  ;;  %v190_v38 = vsel %vm188_vm1, %v185_v30, 0.0  ;;  %v194_v44 = vsel %vm188_vm1, %v187_v39, 0.0 }
  0xd4   :  { %v189_v40 = vsel %vm188_vm1, %v184_v35, 0.0  ;;  %v192_v42 = vsel %vm188_vm1, %v186_v36, 0.0 }
  0xd5   :  { %v191_v41 = vadd.f32 %v190_v38, %v189_v40 }
  0xd7   :  { %v193_v43 = vadd.f32 %v192_v42, %v191_v41 }
  0xd9   :  { %v195_v45 = vadd.f32 %v194_v44, %v193_v43 }
  0xdb   :  { %v196_v46 = vrot.slane %v195_v45, 4 }
  0xdd   :  { %v197_v47 = vadd.f32 %v196_v46, %v195_v45 }
  0xdf   :  { %v198_v48 = vrot.slane %v197_v47, 2 }
  0xe1   :  { %v199_v49 = vadd.f32 %v198_v48, %v197_v47 }
  0xe3   :  { %v200_v50 = vrot.slane %v199_v49, 1 }
  0xe5   :  { %v201_v52 = vadd.f32 %v200_v50, %v199_v49 }
  0xe7   :  { %v204_v53 = vadd.f32 %v203_v51, %v201_v52 }
  0xe9   :  { %v205_v54 = vsub.f32 0.0, %v204_v53 }
  0xeb   :  { %v206_v55 = vmul.f32 1.442695, %v205_v54 }
  0xed   :  { %257 = vpow2.f32 %v206_v55 }
  0xfa   :  { %v258_v56 = vpop.eup %257 }
  0xfb   :  { %v208_v57 = vadd.f32 1.0, %v258_v56 }
  0xfd   :  { %259 = vrcp.f32 %v208_v57 }
 0x10a   :  { %v260_v58 = vpop.eup %259 }
 0x10b   :  { %212 = vst.msk [vmem:[#allocation3] sm:$0x1] %vm211_vm2, %v260_v58 }
 0x10c   :  { %272 = shalt.err (!%p269_p4)
}
 0x10d   :  { %222 = dma.vmem_to_hbm [thread:$0]  %s220_s20, 16, %s380_s5, [#allocation4]  }
 0x10e   :  { %281 = dma.done.wait [#allocation4], 16  }
 0x10f   :  { %282 = vsyncadd [#allocation4], 4294967280 }
 0x110   :  { %226 = vsyncpa [#allocation4], 1 }

// kernel: tpu_custom_call.1
= control target key start
LH: loop header
LB: loop body
LE: loop exit
PB: predicated region body
PF: predicated region fallthrough
CT: control target
= control target key end

     0   :  { %vm52_vm0 = vcmask 130048   ;;  %s375_s0 = inlined_call_operand.vmem [shape: f32[13,16], index: 0, kind: input, shape index: {}]   ;;  %s376_s1 = inlined_call_operand.vmem [shape: f32[32,16], index: 1, kind: input, shape index: {}]   ;;  %s377_s2 = inlined_call_operand.vmem [shape: f32[32,1], index: 2, kind: input, shape index: {}]   ;;  %s378_s3 = inlined_call_operand.vmem [shape: f32[32,1], index: 3, kind: input, shape index: {}]   ;;  %s379_s4 = inlined_call_operand.<no memory space> [shape: f32[1], index: 4, kind: input, shape index: {}]   ;;  %s380_s5 = inlined_call_operand.hbm [shape: f32[1,13], index: 5, kind: output, shape index: {}]  }
   0x1   :  { %v27_v0 = vld [vmem:[%s375_s0 + $0x8] sm:$0x1f]  ;;  %v26_v1 = vld [vmem:[%s375_s0] sm:$0xff]  ;;  %v24_v3 = vld [vmem:[%s376_s1 + $0x10] sm:$0xff] }
   0x2   :  { %239 = vmatprep.subr.msk.mxu0 %vm52_vm0, %v27_v0  ;;  %249 = vmatprep.subr.msk.mxu1 %vm52_vm0, %v27_v0  ;;  %v22_v2 = vld [vmem:[%s376_s1] sm:$0xff]  ;;  %v30_v5 = vld [vmem:[%s377_s2 + $0x10] sm:$0xff] }
   0x3   :  { %240 = vmatpush3.xpose.msk.msra.mxu0 %vm52_vm0, %v27_v0  ;;  %251 = vmatpush3.xpose.msk.msra.mxu1 %vm52_vm0, %v27_v0  ;;  %v28_v4 = vld [vmem:[%s377_s2] sm:$0xff] }
   0x4   :  { %241 = vmatprep.subr.msk.mxu0 %vm52_vm0, %v26_v1  ;;  %250 = vmatprep.subr.msk.mxu1 %vm52_vm0, %v26_v1 }
   0x5   :  { %243 = vmatprep.mubr.msk.f32.mxu0 %vm52_vm0, %v22_v2  ;;  %246 = vmatprep.mubr.msk.f32.mxu1 %vm52_vm0, %v24_v3 }
   0x6   :  { %11 = vsyncpa [#allocation4], 0  ;;  %v283_v6 = vmov 0   ;;  %v23_v7 = vld [vmem:[%s376_s1 + $0x8] sm:$0xff]  ;;  %v25_v8 = vld [vmem:[%s376_s1 + $0x18] sm:$0xff]  ;;  %vm188_vm1 = vcmask 105472   ;;  %v203_v51 = vstv %s379_s4 }
   0x7   :  { %255 = vset.pattern.permute.xlu0 %v283_v6  ;;  %256 = vset.pattern.permute.xlu1 %v283_v6  ;;  %v29_v9 = vld [vmem:[%s377_s2 + $0x8] sm:$0xff]  ;;  %v31_v10 = vld [vmem:[%s377_s2 + $0x18] sm:$0xff]  ;;  %v160_v11 = vld [vmem:[%s378_s3] sm:$0xff]  ;;  %s284_s19 = smov [#allocation3]   ;;  %vm211_vm2 = vcmask 98304  }
   0x8   :  { %242 = vmatpush3.xpose.msk.msra.mxu0 %vm52_vm0, %v26_v1  ;;  %252 = vmatpush3.xpose.msk.msra.mxu1 %vm52_vm0, %v26_v1  ;;  %v161_v12 = vld [vmem:[%s378_s3 + $0x8] sm:$0xff]  ;;  %v162_v13 = vld [vmem:[%s378_s3 + $0x10] sm:$0xff]  ;;  %v163_v14 = vld [vmem:[%s378_s3 + $0x18] sm:$0xff]  ;;  %s219_s20 = sshll.u32 %s284_s19, 4  ;;  %s220_s20 = int_to_ptr.vmem [resolvable:$true] %s219_s20 }
   0x9   :  { %34 = vperm.xlu0 %255, %v28_v4   ;;  %44 = vperm.xlu1 %256, %v30_v5   ;;  %s261_s21 = scalar_lea.vmem %s220_s20, 16  ;;  %s265_s22 = scalar_lea.vmem %s220_s20, 32 }
   0xa   :  { %p262_p0 = scmp.ne.s32.totalorder %s220_s20, %s261_s21  ;;  %p266_p1 = scmp.lt.s32.totalorder %s220_s20, %s220_s20 }
   0xb   :  { %244 = vmatmul.mubr.msk.f32.vlgmr.msra.gmra.mxu0 %vm52_vm0, %v23_v7  ;;  %247 = vmatmul.mubr.msk.f32.vlgmr.msra.gmra.mxu1 %vm52_vm0, %v25_v8  ;;  %p267_p2 = scmp.lt.s32.totalorder %s265_s22, %s261_s21 }
   0xd   :  { %39 = vperm.xlu0 %255, %v29_v9   ;;  %49 = vperm.xlu1 %256, %v31_v10   ;;  %p268_p3 = por %p267_p2, %p266_p1 }
   0xf   :  { %p269_p4 = pnand %p268_p3, %p262_p0 }
  0x11   :  { %166 = vperm.xlu0 %255, %v160_v11   ;;  %171 = vperm.xlu1 %256, %v161_v12  }
  0x15   :  { %176 = vperm.xlu0 %255, %v162_v13   ;;  %181 = vperm.xlu1 %256, %v163_v14  }
  0x84   :  { %v35_v15 = vpop.permute.xlu0 %34  ;;  %v45_v16 = vpop.permute.xlu1 %44 }
  0x88   :  { %v40_v17 = vpop.permute.xlu0 %39  ;;  %v50_v18 = vpop.permute.xlu1 %49 }
  0x8c   :  { %v167_v19 = vpop.permute.xlu0 %166  ;;  %v172_v22 = vpop.permute.xlu1 %171 }
  0x90   :  { %v177_v34 = vpop.permute.xlu0 %176  ;;  %v182_v37 = vpop.permute.xlu1 %181 }
  0xcb   :  { %v245_v20 = vpop.f32.mrf.mxu0  ;;  %v248_v21 = vpop.f32.mrf.mxu1 }
  0xcc   :  { %v143_v23 = vadd.f32 %v245_v20, %v40_v17  ;;  %v153_v24 = vadd.f32 %v248_v21, %v50_v18 }
  0xcd   :  { %v137_v25 = vpop.f32.mrf.mxu0  ;;  %v147_v26 = vpop.f32.mrf.mxu1 }
  0xce   :  { %v157_v27 = vmax.f32 %v143_v23, 0.0  ;;  %v138_v28 = vadd.f32 %v137_v25, %v35_v15  ;;  %v148_v29 = vadd.f32 %v147_v26, %v45_v16  ;;  %v159_v31 = vmax.f32 %v153_v24, 0.0 }
  0xd0   :  { %v185_v30 = vmul.f32 %v172_v22, %v157_v27  ;;  %v156_v32 = vmax.f32 %v138_v28, 0.0  ;;  %v158_v33 = vmax.f32 %v148_v29, 0.0  ;;  %v187_v39 = vmul.f32 %v182_v37, %v159_v31 }
  0xd2   :  { %v184_v35 = vmul.f32 %v167_v19, %v156_v32  ;;  %v186_v36 = vmul.f32 %v177_v34, %v158_v33  ;;  %v190_v38 = vsel %vm188_vm1, %v185_v30, 0.0  ;;  %v194_v44 = vsel %vm188_vm1, %v187_v39, 0.0 }
  0xd4   :  { %v189_v40 = vsel %vm188_vm1, %v184_v35, 0.0  ;;  %v192_v42 = vsel %vm188_vm1, %v186_v36, 0.0 }
  0xd5   :  { %v191_v41 = vadd.f32 %v190_v38, %v189_v40 }
  0xd7   :  { %v193_v43 = vadd.f32 %v192_v42, %v191_v41 }
  0xd9   :  { %v195_v45 = vadd.f32 %v194_v44, %v193_v43 }
  0xdb   :  { %v196_v46 = vrot.slane %v195_v45, 4 }
  0xdd   :  { %v197_v47 = vadd.f32 %v196_v46, %v195_v45 }
  0xdf   :  { %v198_v48 = vrot.slane %v197_v47, 2 }
  0xe1   :  { %v199_v49 = vadd.f32 %v198_v48, %v197_v47 }
  0xe3   :  { %v200_v50 = vrot.slane %v199_v49, 1 }
  0xe5   :  { %v201_v52 = vadd.f32 %v200_v50, %v199_v49 }
  0xe7   :  { %v204_v53 = vadd.f32 %v203_v51, %v201_v52 }
  0xe9   :  { %v205_v54 = vsub.f32 0.0, %v204_v53 }
  0xeb   :  { %v206_v55 = vmul.f32 1.442695, %v205_v54 }
  0xed   :  { %257 = vpow2.f32 %v206_v55 }
  0xfa   :  { %v258_v56 = vpop.eup %257 }
  0xfb   :  { %v208_v57 = vadd.f32 1.0, %v258_v56 }
  0xfd   :  { %259 = vrcp.f32 %v208_v57 }
 0x10a   :  { %v260_v58 = vpop.eup %259 }
 0x10b   :  { %212 = vst.msk [vmem:[#allocation3] sm:$0x1] %vm211_vm2, %v260_v58 }
 0x10c   :  { %272 = shalt.err (!%p269_p4)
}
 0x10d   :  { %222 = dma.vmem_to_hbm [thread:$0]  %s220_s20, 16, %s380_s5, [#allocation4]  }
 0x10e   :  { %281 = dma.done.wait [#allocation4], 16  }
 0x10f   :  { %282 = vsyncadd [#allocation4], 4294967280 }
 0x110   :  { %226 = vsyncpa [#allocation4], 1 }

</bundles_post_ra>
